<compile_context>
chip_gen: v6e
topology: v6e:2x2x1
jax: 0.10.0
libtpu: 0.0.40
codegen_flags: <defaults>
</compile_context>

<pallas_src>
import math

import jax
import jax.numpy as jnp
from jax.experimental import pallas as pl
from jax.experimental.pallas import tpu as pltpu


_BLOCK_BUDGET_BYTES = 4 << 20     # ~4 MiB physical per input block (double-buffered)
_CHUNK_VALUE_BYTES = 128 << 10    # ~128 KiB of f32 values per inner-loop chunk
_VMEM_CAP_BYTES = 48 << 20        # never ask for more (v7x has 64 MiB per TensorCore)


def _round_up(n, m):
    return ((n + m - 1) // m) * m


def _pow2_floor(n):
    n = max(int(n), 1)
    return 1 << (n.bit_length() - 1)


# ---------------------------------------------------------------------------
# pltpu.roll rotation-direction probe (makes the wrap masks convention-proof).
# ---------------------------------------------------------------------------
def _roll_probe_kernel(x_ref, o_ref):
    o_ref[...] = pltpu.roll(x_ref[...], shift=1, axis=1)


def _roll_is_backward():
    """Device bool: True iff pltpu.roll(x, 1, axis)[..., i] == x[..., i-1]."""
    iota = jax.lax.broadcasted_iota(jnp.float32, (8, 128), 1)
    rolled = pl.pallas_call(
        _roll_probe_kernel,
        out_shape=jax.ShapeDtypeStruct((8, 128), jnp.float32),
    )(iota)
    return rolled[0, 0] > 64.0          # 127.0 (jnp.roll convention) vs 1.0 (flipped)


# ---------------------------------------------------------------------------
# Main kernel.
# ---------------------------------------------------------------------------
def _make_tv_kernel(*, planes, tb, tch, L, W, spc, need_mask):
    n_chunks = tb // tch

    def kernel(x_ref, hmask_ref, wmask_ref, h_out_ref, w_out_ref, h_acc, w_acc):
        c = pl.program_id(0)
        i = pl.program_id(1)

        @pl.when(i == 0)
        def _init():
            h_acc[...] = jnp.zeros_like(h_acc)
            w_acc[...] = jnp.zeros_like(w_acc)

        def chunk_body(start, first_plane, masked):
            xc = x_ref[pl.ds(start, tch), :].astype(jnp.float32)       # (tch, L)
            if masked:
                row = jax.lax.broadcasted_iota(jnp.int32, (tch, L), 0)
                xc = jnp.where(first_plane + row < planes, xc, 0.0)
            # Neighbour values via lane rotations (XLU slot, essentially free);
            # per-plane wrap positions are zeroed by the masks at finalize.
            dw = xc - pltpu.roll(xc, shift=1, axis=1)
            dh = xc - pltpu.roll(xc, shift=W, axis=1)
            w_acc[...] += dw * dw
            h_acc[...] += dh * dh

        def accumulate(masked):
            base = (c * spc + i) * tb
            if n_chunks == 1:
                chunk_body(0, base, masked)
            else:
                def body(j, carry):
                    start = pl.multiple_of(j * tch, tch)
                    chunk_body(start, base + j * tch, masked)
                    return carry
                jax.lax.fori_loop(0, n_chunks, body, 0, unroll=(n_chunks <= 8))

        if need_mask:
            # Only the ragged / duplicated tail block pays for the row select.
            tail = (c * spc + i + 1) * tb > planes

            @pl.when(jnp.logical_not(tail))
            def _interior():
                accumulate(False)

            @pl.when(tail)
            def _tail():
                accumulate(True)
        else:
            accumulate(False)

        # Single cross-lane/sublane reduction + (1, 1) store, once per core.
        @pl.when(i == pl.num_programs(1) - 1)
        def _finalize():
            h_out_ref[...] = jnp.broadcast_to(
                jnp.sum(h_acc[...] * hmask_ref[...]), (1, 1))
            w_out_ref[...] = jnp.broadcast_to(
                jnp.sum(w_acc[...] * wmask_ref[...]), (1, 1))

    return kernel


def tv_loss(x, tvloss_weight=1.0):
    """Pallas implementation of TVLoss.forward for NCHW input x."""
    B, C, H, W = x.shape
    planes = B * C
    L = H * W
    itemsize = jnp.dtype(x.dtype).itemsize

    xflat = x.reshape(planes, L)            # free: memory is already contiguous

    # ---- physical-footprint-aware tiling ------------------------------------
    lane_L = _round_up(L, 128)              # lanes are padded to 128
    sub = 8 * max(1, 4 // itemsize)         # sublane multiple for this dtype
    row_bytes = lane_L * itemsize           # physical bytes of one plane row

    # Planes per inner chunk (chunk values are processed in f32).
    tch = min(64, _pow2_floor(max(1, _CHUNK_VALUE_BYTES // (lane_L * 4))))

    if planes * row_bytes <= _BLOCK_BUDGET_BYTES:
        tb = planes                          # everything fits in one block
        tch = max(1, math.gcd(tb, tch))      # largest pow2 chunk dividing tb
    else:
        unit = max(sub, tch)                 # both powers of two
        cap = max(1, _BLOCK_BUDGET_BYTES // row_bytes)
        if cap >= unit:
            tb = (cap // unit) * unit
        else:
            # Huge plane rows: a few rows per block; see TODO(synk) at top.
            tb = cap
            tch = min(tch, tb)
            while tb % tch:
                tch -= 1

    total_blocks = pl.cdiv(planes, tb)

    ncores = 1
    if total_blocks >= 2:
        try:    # only matters on multi-TensorCore chips (v7x); harmless otherwise
            ncores = max(1, min(2, int(getattr(jax.devices()[0], "num_cores", 2))))
        except Exception:
            ncores = 2
    spc = pl.cdiv(total_blocks, ncores)      # grid steps per core
    covered = ncores * spc * tb
    need_mask = covered != planes            # ragged / duplicated tail block(s)

    last_blk = total_blocks - 1
    if ncores * spc > total_blocks:
        x_index_map = lambda c, i: (jnp.minimum(c * spc + i, last_blk), 0)
    else:
        x_index_map = lambda c, i: (c * spc + i, 0)

    # ---- wrap masks (direction-agnostic w.r.t. pltpu.roll) ------------------
    backward = _roll_is_backward()
    pos = jnp.arange(L, dtype=jnp.int32)
    col = pos % W
    w_valid = jnp.where(backward, col != 0, col != (W - 1))
    h_valid = jnp.where(backward, pos >= W, pos < L - W)
    h_mask = h_valid.astype(jnp.float32).reshape(1, L)
    w_mask = w_valid.astype(jnp.float32).reshape(1, L)

    # ---- VMEM budget (physical, double-buffered) ----------------------------
    in_block_phys = _round_up(tb, sub) * lane_L * itemsize
    slab_phys = _round_up(tch, 8) * lane_L * 4
    mask_phys = 8 * lane_L * 4
    vmem_need = 2 * in_block_phys + 2 * slab_phys + 4 * mask_phys + (2 << 20)
    vmem_limit = int(min(_VMEM_CAP_BYTES, max(16 << 20, vmem_need)))

    kernel = _make_tv_kernel(planes=planes, tb=tb, tch=tch, L=L, W=W,
                             spc=spc, need_mask=need_mask)

    h_parts, w_parts = pl.pallas_call(
        kernel,
        out_shape=(jax.ShapeDtypeStruct((ncores, 1), jnp.float32),
                   jax.ShapeDtypeStruct((ncores, 1), jnp.float32)),
        grid=(ncores, spc),
        in_specs=[
            pl.BlockSpec((tb, L), x_index_map),
            pl.BlockSpec((1, L), lambda c, i: (0, 0)),
            pl.BlockSpec((1, L), lambda c, i: (0, 0)),
        ],
        out_specs=(
            pl.BlockSpec((1, 1), lambda c, i: (c, 0)),
            pl.BlockSpec((1, 1), lambda c, i: (c, 0)),
        ),
        scratch_shapes=[
            pltpu.VMEM((tch, L), jnp.float32),
            pltpu.VMEM((tch, L), jnp.float32),
        ],
        compiler_params=pltpu.CompilerParams(
            # "parallel" lets the runtime shard the plane stream across
            # TensorCores on multi-core chips; on 1-TC chips it serializes.
            dimension_semantics=("parallel", "arbitrary"),
            vmem_limit_bytes=vmem_limit,
        ),
        cost_estimate=pl.CostEstimate(
            flops=6 * planes * L,
            transcendentals=0,
            bytes_accessed=planes * L * itemsize + 2 * L * 4 + 2 * ncores * 4,
        ),
    )(xflat, h_mask, w_mask)

    h_tv = jnp.sum(h_parts)
    w_tv = jnp.sum(w_parts)

    # Same count / normalization semantics as the PyTorch module (including
    # its divide-by-zero quirk when H == 1 or W == 1).
    count_h = C * (H - 1) * W
    count_w = C * H * (W - 1)
    return tvloss_weight * 2.0 * (h_tv / count_h + w_tv / count_w) / B


def _tv_loss_ref(x, tvloss_weight=1.0):
    """Pure-JAX reference mirroring the PyTorch forward exactly."""
    B, C, H, W = x.shape
    count_h = C * (H - 1) * W
    count_w = C * H * (W - 1)
    h_tv = jnp.sum((x[:, :, 1:, :] - x[:, :, :H - 1, :]) ** 2)
    w_tv = jnp.sum((x[:, :, :, 1:] - x[:, :, :, :W - 1]) ** 2)
    return tvloss_weight * 2.0 * (h_tv / count_h + w_tv / count_w) / B


if __name__ == "__main__":
    key = jax.random.PRNGKey(0)
    x = jax.random.normal(key, (2, 4, 16, 16), dtype=jnp.float32)

    out = jax.block_until_ready(tv_loss(x))
    ref = jax.block_until_ready(_tv_loss_ref(x))

    assert jnp.allclose(out, ref, rtol=1e-5, atol=1e-5), (out, ref)
    print("KERNEL_OK")
</pallas_src>

<mosaic_0001>
module attributes {stable_mosaic.version = 11 : i64} {
  func.func @_roll_probe_kernel(%arg0: memref<8x128xf32, #tpu.memory_space<vmem>>, %arg1: memref<8x128xf32, #tpu.memory_space<vmem>>) attributes {dimension_semantics = [], scalar_prefetch = 0 : i64, scratch_operands = 0 : i64, tpu.core_type = #tpu.core_type<tc>} {
    %c0 = arith.constant 0 : index
    %c0_0 = arith.constant 0 : index
    %0 = vector.load %arg0[%c0, %c0_0] : memref<8x128xf32, #tpu.memory_space<vmem>>, vector<8x128xf32>
    %c1_i32 = arith.constant 1 : i32
    %1 = tpu.dynamic_rotate %0 by %c1_i32 dim 1 : vector<8x128xf32>, i32 -> vector<8x128xf32>
    %c0_1 = arith.constant 0 : index
    %c0_2 = arith.constant 0 : index
    %2 = vector.load %arg1[%c0_1, %c0_2] : memref<8x128xf32, #tpu.memory_space<vmem>>, vector<8x128xf32>
    tpu.vector_store %arg1[%c0_1, %c0_2], %1 {strides = array<i32>} : memref<8x128xf32, #tpu.memory_space<vmem>>, vector<8x128xf32>,
    return
  }
}

</mosaic_0001>

<bundles_post_ra>
// kernel: tpu_custom_call.1
= control target key start
LH: loop header
LB: loop body
LE: loop exit
PB: predicated region body
PF: predicated region fallthrough
CT: control target
= control target key end

     0   :  { %6 = vsyncpa [#allocation3], 0  ;;  %s106_s0 = inlined_call_operand.hbm [shape: f32[8,128], index: 0, kind: input, shape index: {}]   ;;  %s107_s1 = inlined_call_operand.hbm [shape: f32[8,128], index: 1, kind: output, shape index: {}]  }
   0x1   :  { %7 = vsyncpa [#allocation4], 0  ;;  %s87_s6 = smov [#allocation2]  }
   0x2   :  { %s14_s7 = sshll.u32 %s87_s6, 4  ;;  %s15_s7 = int_to_ptr.vmem [resolvable:$true] %s14_s7 }
   0x3   :  { %s51_s8 = scalar_lea.vmem %s15_s7, 128  ;;  %p56_p1 = scmp.lt.s32.totalorder %s15_s7, %s15_s7 }
   0x4   :  { %p52_p0 = scmp.ne.s32.totalorder %s15_s7, %s51_s8  ;;  %p57_p2 = scmp.lt.s32.totalorder %s51_s8, %s51_s8 }
   0x6   :  { %p58_p3 = por %p57_p2, %p56_p1 }
   0x8   :  { %p59_p4 = pnand %p58_p3, %p52_p0 }
   0xa   :  { %62 = shalt.err (!%p59_p4)
}
   0xb   :  { %17 = dma.hbm_to_vmem [thread:$0]  %s106_s0, 128, %s15_s7, [#allocation3]  }
   0xc   :  { %83 = dma.done.wait [#allocation3], 128  }
   0xd   :  { %84 = vsyncadd [#allocation3], 4294967168  ;;  %v21_v0 = vld [vmem:[#allocation2] sm:$0xff]  ;;  %s88_s11 = smov 1   ;;  %s89_s12 = smov [#allocation5]  }
   0xe   :  { %22 = vrot.lane.b32.xlu0 %v21_v0, %s88_s11  ;;  %s31_s13 = sshll.u32 %s89_s12, 4  ;;  %s32_s13 = int_to_ptr.vmem [resolvable:$true] %s31_s13 }
   0xf   :  { %s63_s14 = scalar_lea.vmem %s32_s13, 128  ;;  %p68_p6 = scmp.lt.s32.totalorder %s32_s13, %s32_s13 }
  0x10   :  { %p64_p5 = scmp.ne.s32.totalorder %s32_s13, %s63_s14  ;;  %p69_p7 = scmp.lt.s32.totalorder %s63_s14, %s63_s14 }
  0x12   :  { %p70_p8 = por %p69_p7, %p68_p6 }
  0x14   :  { %p71_p9 = pnand %p70_p8, %p64_p5 }
  0x80   :  { %v23_v1 = vpop.permute.xlu0 %22 }
  0x81   :  { %24 = vst [vmem:[#allocation5] sm:$0xff] %v23_v1 }
  0x82   :  { %74 = shalt.err (!%p71_p9)
}
  0x83   :  { %34 = dma.vmem_to_hbm [thread:$0]  %s32_s13, 128, %s107_s1, [#allocation4]  }
  0x84   :  { %85 = dma.done.wait [#allocation4], 128  }
  0x85   :  { %86 = vsyncadd [#allocation4], 4294967168 }
  0x86   :  { %38 = vsyncpa [#allocation3], 1 }
  0x87   :  { %39 = vsyncpa [#allocation4], 1 }

</bundles_post_ra>
